<compile_context>
chip_gen: v7x
topology: tpu7x:2x2x1
jax: 0.10.0
libtpu: 0.0.40
codegen_flags: <defaults>
</compile_context>

<pallas_src>
import functools

import jax
import jax.numpy as jnp
from jax.experimental import pallas as pl
from jax.experimental.pallas import tpu as pltpu


def _round_up(x: int, m: int) -> int:
    return ((x + m - 1) // m) * m


def _vmem_budget_bytes() -> int:
    """~80% of physical VMEM: ~102 MiB on v5e/v6e (128 MiB), ~51 MiB on v7x."""
    cap = 128 * 1024 * 1024
    try:
        cap = int(getattr(pltpu.get_tpu_info(), "vmem_capacity_bytes", cap))
    except Exception:
        pass
    return int(cap * 0.8)


def actor_kernel(x_ref, w1_ref, b1_ref, w2_ref, b2_ref, o_ref):
    # x tile: (TM, Dp); weights: (Dp, Dp) VMEM-resident; biases: (1, Dp).
    # Cast activations to the weight dtype so bf16 weights take the native
    # bf16 MXU path; accumulate both matmuls in f32 (preferred_element_type).
    x = x_ref[...].astype(w1_ref.dtype)
    h = jnp.dot(x, w1_ref[...], preferred_element_type=jnp.float32)
    h = jnp.maximum(h + b1_ref[...].astype(jnp.float32), 0.0)
    h = h.astype(w2_ref.dtype)
    o = jnp.dot(h, w2_ref[...], preferred_element_type=jnp.float32)
    o_ref[...] = (o + b2_ref[...].astype(jnp.float32)).astype(o_ref.dtype)


@functools.partial(jax.jit, static_argnames=("block_m", "single_buffer_weights"))
def _actor_forward_impl(x, w1_t, b1, w2_t, b2, *, block_m, single_buffer_weights):
    B, D = x.shape
    dt_x = x.dtype
    dt_w = w1_t.dtype
    xbytes = jnp.dtype(dt_x).itemsize
    wbytes = jnp.dtype(dt_w).itemsize

    # --- lane-dense / sublane-aligned padding targets -----------------------
    Dp = _round_up(D, 128)                       # lane-dense feature dim
    row_align = 8 if wbytes >= 4 else (16 if wbytes == 2 else 32)

    # --- VMEM budget (per generation) and tile-size derivation --------------
    budget = _vmem_budget_bytes()
    wbuf = 1 if single_buffer_weights else 2     # buffers per weight/bias array
    resident = wbuf * (2 * Dp * Dp + 2 * Dp) * wbytes
    # per batch-row cost: double-buffered x + out tiles, plus f32 h/o scratch
    per_row = Dp * (4 * xbytes + 8)

    if resident + row_align * per_row > budget:
        # Weights cannot stay VMEM-resident at this D on this generation.
        # TODO(synk): tile w1/w2 over an output-column grid axis (+ K-reduction
        # with an f32 accumulator) for very large D; plain XLA fallback for now.
        h = jnp.maximum(
            jnp.dot(x.astype(dt_w), w1_t, preferred_element_type=jnp.float32)
            + b1.astype(jnp.float32), 0.0).astype(dt_w)
        o = (jnp.dot(h, w2_t, preferred_element_type=jnp.float32)
             + b2.astype(jnp.float32))
        return o.astype(dt_x)

    tm_budget = max(row_align, ((budget - resident) // per_row) // row_align * row_align)
    tm = min(block_m, tm_budget, _round_up(B, row_align))
    tm = max(row_align, (tm // row_align) * row_align)
    # Guarantee >= 2 grid steps (v7x megacore split + pipelining) when B permits.
    if B > row_align and tm >= _round_up(B, row_align):
        tm = max(row_align, _round_up((B + 1) // 2, row_align))
    Bp = _round_up(B, tm)
    grid = (Bp // tm,)

    # --- padded operands (zero-padded lanes stay zero through the MLP) ------
    x_p = jnp.pad(x, ((0, Bp - B), (0, Dp - D)))
    w1_p = jnp.pad(w1_t, ((0, Dp - D), (0, Dp - D)))
    w2_p = jnp.pad(w2_t, ((0, Dp - D), (0, Dp - D)))
    b1_p = jnp.pad(b1, ((0, 0), (0, Dp - D)))
    b2_p = jnp.pad(b2, ((0, 0), (0, Dp - D)))

    # Weights/biases never change across grid steps -> single buffer if allowed.
    def _resident_spec(shape):
        if single_buffer_weights:
            return pl.BlockSpec(shape, lambda i: (0, 0), pipeline_mode=pl.Buffered(1))
        return pl.BlockSpec(shape, lambda i: (0, 0))

    cost = pl.CostEstimate(
        flops=2 * 2 * Bp * Dp * Dp,
        transcendentals=0,
        bytes_accessed=2 * Bp * Dp * xbytes            # x in + out
        + (2 * Dp * Dp + 2 * Dp) * wbytes,             # weights + biases
    )

    out_p = pl.pallas_call(
        actor_kernel,
        out_shape=jax.ShapeDtypeStruct((Bp, Dp), dt_x),
        grid=grid,
        in_specs=[
            pl.BlockSpec((tm, Dp), lambda i: (i, 0)),  # x: tiled over batch
            _resident_spec((Dp, Dp)),                  # w1
            _resident_spec((1, Dp)),                   # b1
            _resident_spec((Dp, Dp)),                  # w2
            _resident_spec((1, Dp)),                   # b2
        ],
        out_specs=pl.BlockSpec((tm, Dp), lambda i: (i, 0)),   # lane-dense output
        compiler_params=pltpu.CompilerParams(
            dimension_semantics=("parallel",),          # megacore batch split
            vmem_limit_bytes=int(budget),
        ),
        cost_estimate=cost,
    )(x_p, w1_p, b1_p, w2_p, b2_p)

    return out_p[:B, :D]


def actor_forward(x, w1_t, b1, w2_t, b2, *, block_m: int = 256):
    """x: (B, D); w1_t, w2_t: (D, D) pre-transposed; b1, b2: (1, D) -> (B, D)."""
    try:
        # Preferred plan: single-buffered resident weights (halves weight VMEM).
        return _actor_forward_impl(x, w1_t, b1, w2_t, b2,
                                   block_m=block_m, single_buffer_weights=True)
    except Exception:
        # Older builds may reject pipeline_mode=Buffered(1); use defaults.
        return _actor_forward_impl(x, w1_t, b1, w2_t, b2,
                                   block_m=block_m, single_buffer_weights=False)


def init_actor_params(key, in_dim, dtype=jnp.float32):
    """PyTorch nn.Linear-like init; weights returned pre-transposed (in, out)."""
    k1, k2, k3, k4 = jax.random.split(key, 4)
    bound = 1.0 / jnp.sqrt(in_dim)
    w1 = jax.random.uniform(k1, (in_dim, in_dim), jnp.float32, -bound, bound)
    b1 = jax.random.uniform(k2, (in_dim,), jnp.float32, -bound, bound)
    w2 = jax.random.uniform(k3, (in_dim, in_dim), jnp.float32, -bound, bound)
    b2 = jax.random.uniform(k4, (in_dim,), jnp.float32, -bound, bound)
    return (w1.T.astype(dtype), b1.reshape(1, -1).astype(dtype),
            w2.T.astype(dtype), b2.reshape(1, -1).astype(dtype))


def actor_reference(x, w1_t, b1, w2_t, b2):
    h = jnp.maximum(x @ w1_t.astype(jnp.float32) + b1.astype(jnp.float32), 0.0)
    return h @ w2_t.astype(jnp.float32) + b2.astype(jnp.float32)


if __name__ == "__main__":
    key = jax.random.PRNGKey(0)
    k_x, k_p, k_x2, k_p2 = jax.random.split(key, 4)

    # Small demo consistent with Actor(in_dim).  NOTE: at D=32 the 128-lane
    # padding makes this launch/DMA-overhead bound; the Pallas path pays off
    # once in_dim is a few hundred+ (second check below).
    batch, in_dim = 8, 32
    x = jax.random.normal(k_x, (batch, in_dim), dtype=jnp.float32)
    w1_t, b1, w2_t, b2 = init_actor_params(k_p, in_dim, dtype=jnp.float32)

    out = jax.block_until_ready(actor_forward(x, w1_t, b1, w2_t, b2))
    ref = actor_reference(x, w1_t, b1, w2_t, b2)
    assert out.shape == (batch, in_dim)
    assert jnp.allclose(out, ref, atol=2e-5, rtol=2e-5), "mismatch vs reference (small)"

    # Second config exercising >=2 grid steps, batch padding, resident weights.
    batch2, in_dim2 = 96, 256
    x2 = jax.random.normal(k_x2, (batch2, in_dim2), dtype=jnp.float32)
    p2 = init_actor_params(k_p2, in_dim2, dtype=jnp.float32)
    out2 = jax.block_until_ready(actor_forward(x2, *p2))
    ref2 = actor_reference(x2, *p2)
    assert out2.shape == (batch2, in_dim2)
    assert jnp.allclose(out2, ref2, atol=1e-3, rtol=1e-3), "mismatch vs reference (large)"

    print("KERNEL_OK")
</pallas_src>

<mosaic_0001>
module attributes {stable_mosaic.version = 11 : i64} {
  func.func @actor_kernel(%arg0: i32, %arg1: memref<8x128xf32, #tpu.memory_space<vmem>>, %arg2: memref<128x128xf32, #tpu.memory_space<vmem>>, %arg3: memref<1x128xf32, #tpu.memory_space<vmem>>, %arg4: memref<128x128xf32, #tpu.memory_space<vmem>>, %arg5: memref<1x128xf32, #tpu.memory_space<vmem>>, %arg6: memref<8x128xf32, #tpu.memory_space<vmem>>) attributes {dimension_semantics = [#tpu.dimension_semantics<parallel>], iteration_bounds = array<i64: 1>, scalar_prefetch = 0 : i64, scratch_operands = 0 : i64, tpu.core_type = #tpu.core_type<tc>, window_params = [{transform_indices = @transform_0, window_bounds = array<i64: 8, 128>}, {pipeline_mode = #tpu.pipeline_mode<synchronous>, transform_indices = @transform_1, window_bounds = array<i64: 128, 128>}, {pipeline_mode = #tpu.pipeline_mode<synchronous>, transform_indices = @transform_2, window_bounds = array<i64: 1, 128>}, {pipeline_mode = #tpu.pipeline_mode<synchronous>, transform_indices = @transform_3, window_bounds = array<i64: 128, 128>}, {pipeline_mode = #tpu.pipeline_mode<synchronous>, transform_indices = @transform_4, window_bounds = array<i64: 1, 128>}, {transform_indices = @transform_5, window_bounds = array<i64: 8, 128>}]} {
    %c0 = arith.constant 0 : index
    %c0_0 = arith.constant 0 : index
    %0 = vector.load %arg1[%c0, %c0_0] : memref<8x128xf32, #tpu.memory_space<vmem>>, vector<8x128xf32>
    %c0_1 = arith.constant 0 : index
    %c0_2 = arith.constant 0 : index
    %1 = vector.load %arg2[%c0_1, %c0_2] : memref<128x128xf32, #tpu.memory_space<vmem>>, vector<128x128xf32>
    %cst = arith.constant dense<0.000000e+00> : vector<8x128xf32>
    %2 = tpu.matmul %0, %1, %cst {dimension_numbers = #tpu.dot_dimension_numbers<[1], [0], [0], [1], [0, 0, 1, 1], [], []>} : vector<8x128xf32>, vector<128x128xf32>, vector<8x128xf32> -> vector<8x128xf32>
    %c0_3 = arith.constant 0 : index
    %c0_4 = arith.constant 0 : index
    %3 = vector.load %arg3[%c0_3, %c0_4] : memref<1x128xf32, #tpu.memory_space<vmem>>, vector<1x128xf32>
    %4 = vector.broadcast %3 : vector<1x128xf32> to vector<8x128xf32>
    %5 = arith.addf %2, %4 : vector<8x128xf32>
    %cst_5 = arith.constant 0.000000e+00 : f32
    %6 = vector.broadcast %cst_5 : f32 to vector<8x128xf32>
    %7 = arith.maximumf %5, %6 : vector<8x128xf32>
    %c0_6 = arith.constant 0 : index
    %c0_7 = arith.constant 0 : index
    %8 = vector.load %arg4[%c0_6, %c0_7] : memref<128x128xf32, #tpu.memory_space<vmem>>, vector<128x128xf32>
    %cst_8 = arith.constant dense<0.000000e+00> : vector<8x128xf32>
    %9 = tpu.matmul %7, %8, %cst_8 {dimension_numbers = #tpu.dot_dimension_numbers<[1], [0], [0], [1], [0, 0, 1, 1], [], []>} : vector<8x128xf32>, vector<128x128xf32>, vector<8x128xf32> -> vector<8x128xf32>
    %c0_9 = arith.constant 0 : index
    %c0_10 = arith.constant 0 : index
    %10 = vector.load %arg5[%c0_9, %c0_10] : memref<1x128xf32, #tpu.memory_space<vmem>>, vector<1x128xf32>
    %11 = vector.broadcast %10 : vector<1x128xf32> to vector<8x128xf32>
    %12 = arith.addf %9, %11 : vector<8x128xf32>
    %c0_11 = arith.constant 0 : index
    %c0_12 = arith.constant 0 : index
    %13 = vector.load %arg6[%c0_11, %c0_12] : memref<8x128xf32, #tpu.memory_space<vmem>>, vector<8x128xf32>
    tpu.vector_store %arg6[%c0_11, %c0_12], %12 {strides = array<i32>} : memref<8x128xf32, #tpu.memory_space<vmem>>, vector<8x128xf32>,
    return
  }
  func.func @transform_0(%arg0: i32) -> (i32, i32) {
    %c0_i32 = arith.constant 0 : i32
    %c0_i32_0 = arith.constant 0 : i32
    return %arg0, %c0_i32 : i32, i32
  }
  func.func @transform_1(%arg0: i32) -> (i32, i32) {
    %c0_i32 = arith.constant 0 : i32
    %c0_i32_0 = arith.constant 0 : i32
    %c0_i32_1 = arith.constant 0 : i32
    return %c0_i32, %c0_i32_0 : i32, i32
  }
  func.func @transform_2(%arg0: i32) -> (i32, i32) {
    %c0_i32 = arith.constant 0 : i32
    %c0_i32_0 = arith.constant 0 : i32
    %c0_i32_1 = arith.constant 0 : i32
    return %c0_i32, %c0_i32_0 : i32, i32
  }
  func.func @transform_3(%arg0: i32) -> (i32, i32) {
    %c0_i32 = arith.constant 0 : i32
    %c0_i32_0 = arith.constant 0 : i32
    %c0_i32_1 = arith.constant 0 : i32
    return %c0_i32, %c0_i32_0 : i32, i32
  }
  func.func @transform_4(%arg0: i32) -> (i32, i32) {
    %c0_i32 = arith.constant 0 : i32
    %c0_i32_0 = arith.constant 0 : i32
    %c0_i32_1 = arith.constant 0 : i32
    return %c0_i32, %c0_i32_0 : i32, i32
  }
  func.func @transform_5(%arg0: i32) -> (i32, i32) {
    %c0_i32 = arith.constant 0 : i32
    %c0_i32_0 = arith.constant 0 : i32
    return %arg0, %c0_i32 : i32, i32
  }
}

module attributes {stable_mosaic.version = 11 : i64} {
  func.func @actor_kernel(%arg0: i32, %arg1: memref<8x128xf32, #tpu.memory_space<vmem>>, %arg2: memref<128x128xf32, #tpu.memory_space<vmem>>, %arg3: memref<1x128xf32, #tpu.memory_space<vmem>>, %arg4: memref<128x128xf32, #tpu.memory_space<vmem>>, %arg5: memref<1x128xf32, #tpu.memory_space<vmem>>, %arg6: memref<8x128xf32, #tpu.memory_space<vmem>>) attributes {dimension_semantics = [#tpu.dimension_semantics<parallel>], iteration_bounds = array<i64: 1>, scalar_prefetch = 0 : i64, scratch_operands = 0 : i64, tpu.core_type = #tpu.core_type<tc>, window_params = [{transform_indices = @transform_0, window_bounds = array<i64: 8, 128>}, {pipeline_mode = #tpu.pipeline_mode<synchronous>, transform_indices = @transform_1, window_bounds = array<i64: 128, 128>}, {pipeline_mode = #tpu.pipeline_mode<synchronous>, transform_indices = @transform_2, window_bounds = array<i64: 1, 128>}, {pipeline_mode = #tpu.pipeline_mode<synchronous>, transform_indices = @transform_3, window_bounds = array<i64: 128, 128>}, {pipeline_mode = #tpu.pipeline_mode<synchronous>, transform_indices = @transform_4, window_bounds = array<i64: 1, 128>}, {transform_indices = @transform_5, window_bounds = array<i64: 8, 128>}]} {
    %c0 = arith.constant 0 : index
    %c0_0 = arith.constant 0 : index
    %0 = vector.load %arg1[%c0, %c0_0] : memref<8x128xf32, #tpu.memory_space<vmem>>, vector<8x128xf32>
    %c0_1 = arith.constant 0 : index
    %c0_2 = arith.constant 0 : index
    %1 = vector.load %arg2[%c0_1, %c0_2] : memref<128x128xf32, #tpu.memory_space<vmem>>, vector<128x128xf32>
    %cst = arith.constant dense<0.000000e+00> : vector<8x128xf32>
    %2 = tpu.matmul %0, %1, %cst {dimension_numbers = #tpu.dot_dimension_numbers<[1], [0], [0], [1], [0, 0, 1, 1], [], []>} : vector<8x128xf32>, vector<128x128xf32>, vector<8x128xf32> -> vector<8x128xf32>
    %c0_3 = arith.constant 0 : index
    %c0_4 = arith.constant 0 : index
    %3 = vector.load %arg3[%c0_3, %c0_4] : memref<1x128xf32, #tpu.memory_space<vmem>>, vector<1x128xf32>
    %4 = vector.broadcast %3 : vector<1x128xf32> to vector<8x128xf32>
    %5 = arith.addf %2, %4 : vector<8x128xf32>
    %cst_5 = arith.constant 0.000000e+00 : f32
    %6 = vector.broadcast %cst_5 : f32 to vector<8x128xf32>
    %7 = arith.maximumf %5, %6 : vector<8x128xf32>
    %c0_6 = arith.constant 0 : index
    %c0_7 = arith.constant 0 : index
    %8 = vector.load %arg4[%c0_6, %c0_7] : memref<128x128xf32, #tpu.memory_space<vmem>>, vector<128x128xf32>
    %cst_8 = arith.constant dense<0.000000e+00> : vector<8x128xf32>
    %9 = tpu.matmul %7, %8, %cst_8 {dimension_numbers = #tpu.dot_dimension_numbers<[1], [0], [0], [1], [0, 0, 1, 1], [], []>} : vector<8x128xf32>, vector<128x128xf32>, vector<8x128xf32> -> vector<8x128xf32>
    %c0_9 = arith.constant 0 : index
    %c0_10 = arith.constant 0 : index
    %10 = vector.load %arg5[%c0_9, %c0_10] : memref<1x128xf32, #tpu.memory_space<vmem>>, vector<1x128xf32>
    %11 = vector.broadcast %10 : vector<1x128xf32> to vector<8x128xf32>
    %12 = arith.addf %9, %11 : vector<8x128xf32>
    %c0_11 = arith.constant 0 : index
    %c0_12 = arith.constant 0 : index
    %13 = vector.load %arg6[%c0_11, %c0_12] : memref<8x128xf32, #tpu.memory_space<vmem>>, vector<8x128xf32>
    tpu.vector_store %arg6[%c0_11, %c0_12], %12 {strides = array<i32>} : memref<8x128xf32, #tpu.memory_space<vmem>>, vector<8x128xf32>,
    return
  }
  func.func @transform_0(%arg0: i32) -> (i32, i32) {
    %c0_i32 = arith.constant 0 : i32
    %c0_i32_0 = arith.constant 0 : i32
    return %arg0, %c0_i32 : i32, i32
  }
  func.func @transform_1(%arg0: i32) -> (i32, i32) {
    %c0_i32 = arith.constant 0 : i32
    %c0_i32_0 = arith.constant 0 : i32
    %c0_i32_1 = arith.constant 0 : i32
    return %c0_i32, %c0_i32_0 : i32, i32
  }
  func.func @transform_2(%arg0: i32) -> (i32, i32) {
    %c0_i32 = arith.constant 0 : i32
    %c0_i32_0 = arith.constant 0 : i32
    %c0_i32_1 = arith.constant 0 : i32
    return %c0_i32, %c0_i32_0 : i32, i32
  }
  func.func @transform_3(%arg0: i32) -> (i32, i32) {
    %c0_i32 = arith.constant 0 : i32
    %c0_i32_0 = arith.constant 0 : i32
    %c0_i32_1 = arith.constant 0 : i32
    return %c0_i32, %c0_i32_0 : i32, i32
  }
  func.func @transform_4(%arg0: i32) -> (i32, i32) {
    %c0_i32 = arith.constant 0 : i32
    %c0_i32_0 = arith.constant 0 : i32
    %c0_i32_1 = arith.constant 0 : i32
    return %c0_i32, %c0_i32_0 : i32, i32
  }
  func.func @transform_5(%arg0: i32) -> (i32, i32) {
    %c0_i32 = arith.constant 0 : i32
    %c0_i32_0 = arith.constant 0 : i32
    return %arg0, %c0_i32 : i32, i32
  }
}

</mosaic_0001>

<bundles_post_ra>
// kernel: _actor_forward_impl.1
= control target key start
LH: loop header
LB: loop body
LE: loop exit
PB: predicated region body
PF: predicated region fallthrough
CT: control target
= control target key end

     0   :  { %10 = vsyncpa [#allocation3], 0  ;;  %s723_s0 = inlined_call_operand.hbm [shape: f32[8,128], index: 0, kind: input, shape index: {}]   ;;  %s724_s1 = inlined_call_operand.hbm [shape: f32[128,128], index: 1, kind: input, shape index: {}]   ;;  %s725_s2 = inlined_call_operand.hbm [shape: f32[1,128], index: 2, kind: input, shape index: {}]   ;;  %s726_s3 = inlined_call_operand.hbm [shape: f32[128,128], index: 3, kind: input, shape index: {}]   ;;  %s727_s4 = inlined_call_operand.hbm [shape: f32[1,128], index: 4, kind: input, shape index: {}]   ;;  %s728_s5 = inlined_call_operand.hbm [shape: f32[8,128], index: 5, kind: output, shape index: {}]  }
   0x1   :  { %11 = vsyncpa [#allocation6], 0 }
   0x2   :  { %12 = vsyncpa [#allocation9], 0 }
   0x3   :  { %13 = vsyncpa [#allocation4], 0  ;;  %s594_s18 = smov [#allocation5]   ;;  %s454_s22 = scalar_lea.hbm %s724_s1, 2048 }
   0x4   :  { %s29_s19 = sshll.u32 %s594_s18, 4  ;;  %p455_p0 = scmp.ne.s32.totalorder %s724_s1, %s454_s22  ;;  %s30_s19 = int_to_ptr.vmem [resolvable:$true] %s29_s19 }
   0x5   :  { %p458_p1 = scmp.lt.u32.totalorder %s454_s22, %s724_s1 }
   0x7   :  { %p460_p2 = pnand %p458_p1, %p455_p0 }
   0x9   :  { %463 = shalt.err (!%p460_p2)
}
   0xa   :  { %s464_s27 = scalar_lea.vmem %s30_s19, 2048  ;;  %p469_p4 = scmp.lt.s32.totalorder %s30_s19, %s30_s19 }
   0xb   :  { %p465_p3 = scmp.ne.s32.totalorder %s30_s19, %s464_s27  ;;  %p470_p5 = scmp.lt.s32.totalorder %s464_s27, %s464_s27 }
   0xd   :  { %p471_p6 = por %p470_p5, %p469_p4 }
   0xf   :  { %p472_p7 = pnand %p471_p6, %p465_p3 }
  0x11   :  { %475 = shalt.err (!%p472_p7)
}
  0x12   :  { %s595_s28 = smov 128   ;;  %s596_s29 = smov 8  }
  0x13   :  { %35 = dma.hbm_to_vmem [thread:$0]  %s724_s1, 2048, %s30_s19, [#allocation6], %s595_s28, %s595_s28, %s596_s29  }
  0x14   :  { %s597_s7 = smov [#allocation8]   ;;  %s598_s9 = smov [#allocation2]  }
  0x15   :  { %s51_s8 = sshll.u32 %s597_s7, 4  ;;  %s20_s10 = sshll.u32 %s598_s9, 4  ;;  %s52_s8 = int_to_ptr.vmem [resolvable:$true] %s51_s8  ;;  %s21_s10 = int_to_ptr.vmem [resolvable:$true] %s20_s10 }
  0x16   :  { %s476_s13 = scalar_lea.hbm %s726_s3, 2048 }
  0x17   :  { %p477_p8 = scmp.ne.s32.totalorder %s726_s3, %s476_s13  ;;  %p480_p9 = scmp.lt.u32.totalorder %s476_s13, %s726_s3 }
  0x19   :  { %p482_p10 = pnand %p480_p9, %p477_p8 }
  0x1b   :  { %485 = shalt.err (!%p482_p10)
}
  0x1c   :  { %s486_s1 = scalar_lea.vmem %s52_s8, 2048  ;;  %p491_p12 = scmp.lt.s32.totalorder %s52_s8, %s52_s8 }
  0x1d   :  { %p487_p11 = scmp.ne.s32.totalorder %s52_s8, %s486_s1  ;;  %p492_p13 = scmp.lt.s32.totalorder %s486_s1, %s486_s1 }
  0x1f   :  { %p493_p0 = por %p492_p13, %p491_p12 }
  0x21   :  { %p494_p1 = pnand %p493_p0, %p487_p11 }
  0x23   :  { %497 = shalt.err (!%p494_p1)
}
  0x24   :  { %57 = dma.hbm_to_vmem [thread:$0]  %s726_s3, 2048, %s52_s8, [#allocation9], %s595_s28, %s595_s28, %s596_s29  }
  0x25   :  { %s498_s22 = scalar_lea.hbm %s723_s0, 128 }
  0x26   :  { %p499_p2 = scmp.ne.s32.totalorder %s723_s0, %s498_s22  ;;  %p502_p3 = scmp.lt.u32.totalorder %s498_s22, %s723_s0 }
  0x28   :  { %p504_p4 = pnand %p502_p3, %p499_p2 }
  0x2a   :  { %507 = shalt.err (!%p504_p4)
}
  0x2b   :  { %s508_s27 = scalar_lea.vmem %s21_s10, 128  ;;  %p513_p6 = scmp.lt.s32.totalorder %s21_s10, %s21_s10 }
  0x2c   :  { %p509_p5 = scmp.ne.s32.totalorder %s21_s10, %s508_s27  ;;  %p514_p7 = scmp.lt.s32.totalorder %s508_s27, %s508_s27 }
  0x2e   :  { %p515_p8 = por %p514_p7, %p513_p6 }
  0x30   :  { %p516_p9 = pnand %p515_p8, %p509_p5 }
  0x32   :  { %519 = shalt.err (!%p516_p9)
}
  0x33   :  { %23 = dma.hbm_to_vmem [thread:$0]  %s723_s0, 128, %s21_s10, [#allocation3]  }
  0x34   :  { %s599_s29 = smov [#allocation7]   ;;  %s600_s6 = smov [#allocation10]  }
  0x35   :  { %s42_s30 = sshll.u32 %s599_s29, 4  ;;  %s64_s7 = sshll.u32 %s600_s6, 4  ;;  %s43_s30 = int_to_ptr.vmem [resolvable:$true] %s42_s30  ;;  %s65_s7 = int_to_ptr.vmem [resolvable:$true] %s64_s7 }
  0x36   :  { %s520_s11 = scalar_lea.hbm %s725_s2, 16 }
  0x37   :  { %p521_p10 = scmp.ne.s32.totalorder %s725_s2, %s520_s11  ;;  %p524_p11 = scmp.lt.u32.totalorder %s520_s11, %s725_s2 }
  0x39   :  { %p526_p12 = pnand %p524_p11, %p521_p10 }
  0x3b   :  { %529 = shalt.err (!%p526_p12)
}
  0x3c   :  { %s530_s0 = scalar_lea.vmem %s43_s30, 16  ;;  %s534_s10 = scalar_lea.vmem %s43_s30, 32 }
  0x3d   :  { %p531_p13 = scmp.ne.s32.totalorder %s43_s30, %s530_s0  ;;  %p535_p0 = scmp.lt.s32.totalorder %s43_s30, %s43_s30 }
  0x3e   :  { %p536_p1 = scmp.lt.s32.totalorder %s534_s10, %s530_s0 }
  0x40   :  { %p537_p2 = por %p536_p1, %p535_p0 }
  0x42   :  { %p538_p3 = pnand %p537_p2, %p531_p13 }
  0x44   :  { %541 = shalt.err (!%p538_p3)
}
  0x45   :  { %45 = dma.hbm_to_vmem [thread:$0]  %s725_s2, 16, %s43_s30, [#allocation6]  }
  0x46   :  { %s542_s19 = scalar_lea.hbm %s727_s4, 16 }
  0x47   :  { %p543_p4 = scmp.ne.s32.totalorder %s727_s4, %s542_s19  ;;  %p546_p5 = scmp.lt.u32.totalorder %s542_s19, %s727_s4 }
  0x49   :  { %p548_p6 = pnand %p546_p5, %p543_p4 }
  0x4b   :  { %551 = shalt.err (!%p548_p6)
}
  0x4c   :  { %s552_s24 = scalar_lea.vmem %s65_s7, 16  ;;  %s556_s25 = scalar_lea.vmem %s65_s7, 32 }
  0x4d   :  { %p553_p7 = scmp.ne.s32.totalorder %s65_s7, %s552_s24  ;;  %p557_p8 = scmp.lt.s32.totalorder %s65_s7, %s65_s7 }
  0x4e   :  { %p558_p9 = scmp.lt.s32.totalorder %s556_s25, %s552_s24 }
  0x50   :  { %p559_p10 = por %p558_p9, %p557_p8 }
  0x52   :  { %p560_p11 = pnand %p559_p10, %p553_p7 }
  0x54   :  { %563 = shalt.err (!%p560_p11)
}
  0x55   :  { %67 = dma.hbm_to_vmem [thread:$0]  %s727_s4, 16, %s65_s7, [#allocation9]  }
  0x56   :  { %586 = dma.done.wait [#allocation3], 128  }
  0x57   :  { %587 = vsyncadd [#allocation3], 4294967168 }
  0x58   :  { %588 = dma.done.wait [#allocation6], 2064  }
  0x59   :  { %589 = vsyncadd [#allocation6], 4294965232 }
  0x5a   :  { %590 = dma.done.wait [#allocation9], 2064  }
  0x5b   :  { %591 = vsyncadd [#allocation9], 4294965232  ;;  %v601_v0 = vmov 0.0|0.0   ;;  %vm602_vm0 = vmmov 0   ;;  %v603_v1 = vmov 0.0   ;;  %v84_v2 = vld [vmem:[#allocation5] sm:$0xff] }
  0x5c   :  { %395 = vmatprep.subr.bf16.mxu0 %v601_v0  ;;  %357 = vmatprep.mubr.msk.f32.mxu0 %vm602_vm0, %v603_v1  ;;  %v85_v3 = vld [vmem:[#allocation5 + $0x8] sm:$0xff]  ;;  %v86_v4 = vld [vmem:[#allocation5 + $0x10] sm:$0xff]  ;;  %v87_v6 = vld [vmem:[#allocation5 + $0x18] sm:$0xff]  ;;  %s604_s4 = smov [#allocation11]  }
  0x5d   :  { %419 = vmatprep.subr.bf16.mxu1 %v601_v0  ;;  %392 = vmatprep.mubr.msk.f32.mxu1 %vm602_vm0, %v603_v1  ;;  %v396_v5 = vpack.c.bf16 %v85_v3, %v84_v2  ;;  %v399_v7 = vpack.c.bf16 %v87_v6, %v86_v4  ;;  %v88_v8 = vld [vmem:[#allocation5 + $0x20] sm:$0xff]  ;;  %v89_v9 = vld [vmem:[#allocation5 + $0x28] sm:$0xff]  ;;  %v180_v12 = vld [vmem:[#allocation8 + $0x10] sm:$0xff]  ;;  %s278_s27 = sshll.u32 %s604_s4, 4  ;;  %s279_s27 = int_to_ptr.vmem [resolvable:$true] %s278_s27 }
  0x5e   :  { %v178_v10 = vld [vmem:[#allocation8] sm:$0xff]  ;;  %v179_v11 = vld [vmem:[#allocation8 + $0x8] sm:$0xff]  ;;  %v181_v13 = vld [vmem:[#allocation8 + $0x18] sm:$0xff]  ;;  %v402_v14 = vpack.c.bf16 %v89_v9, %v88_v8  ;;  %s564_s3 = scalar_lea.vmem %s279_s27, 128  ;;  %p569_p13 = scmp.lt.s32.totalorder %s279_s27, %s279_s27 }
  0x5f   :  { %397 = vmatpush3.bf16.msra.mxu0 %v396_v5  ;;  %v420_v15 = vpack.c.bf16 %v179_v11, %v178_v10  ;;  %v90_v16 = vld [vmem:[#allocation5 + $0x30] sm:$0xff]  ;;  %v91_v17 = vld [vmem:[#allocation5 + $0x38] sm:$0xff]  ;;  %v423_v18 = vpack.c.bf16 %v181_v13, %v180_v12  ;;  %v182_v19 = vld [vmem:[#allocation8 + $0x20] sm:$0xff]  ;;  %p565_p12 = scmp.ne.s32.totalorder %s279_s27, %s564_s3  ;;  %p570_p0 = scmp.lt.s32.totalorder %s564_s3, %s564_s3 }
  0x60   :  { %398 = vmatprep.subr.bf16.mxu0 %v601_v0  ;;  %v183_v20 = vld [vmem:[#allocation8 + $0x28] sm:$0xff]  ;;  %v405_v21 = vpack.c.bf16 %v91_v17, %v90_v16  ;;  %v92_v22 = vld [vmem:[#allocation5 + $0x40] sm:$0xff]  ;;  %v184_v25 = vld [vmem:[#allocation8 + $0x30] sm:$0xff] }
  0x61   :  { %421 = vmatpush3.bf16.msra.mxu1 %v420_v15  ;;  %v93_v23 = vld [vmem:[#allocation5 + $0x48] sm:$0xff]  ;;  %v426_v24 = vpack.c.bf16 %v183_v20, %v182_v19  ;;  %v185_v26 = vld [vmem:[#allocation8 + $0x38] sm:$0xff]  ;;  %v94_v28 = vld [vmem:[#allocation5 + $0x50] sm:$0xff]  ;;  %p571_p1 = por %p570_p0, %p569_p13 }
  0x62   :  { %422 = vmatprep.subr.bf16.mxu1 %v601_v0  ;;  %v408_v27 = vpack.c.bf16 %v93_v23, %v92_v22  ;;  %v95_v29 = vld [vmem:[#allocation5 + $0x58] sm:$0xff]  ;;  %v429_v30 = vpack.c.bf16 %v185_v26, %v184_v25  ;;  %v186_v31 = vld [vmem:[#allocation8 + $0x40] sm:$0xff]  ;;  %v187_v32 = vld [vmem:[#allocation8 + $0x48] sm:$0xff] }
  0x63   :  { %400 = vmatpush3.bf16.msra.mxu0 %v399_v7  ;;  %v411_v33 = vpack.c.bf16 %v95_v29, %v94_v28  ;;  %v96_v34 = vld [vmem:[#allocation5 + $0x60] sm:$0xff]  ;;  %v97_v35 = vld [vmem:[#allocation5 + $0x68] sm:$0xff]  ;;  %v432_v36 = vpack.c.bf16 %v187_v32, %v186_v31  ;;  %v188_v37 = vld [vmem:[#allocation8 + $0x50] sm:$0xff]  ;;  %p572_p2 = pnand %p571_p1, %p565_p12 }
  0x64   :  { %401 = vmatprep.subr.bf16.mxu0 %v601_v0  ;;  %v189_v38 = vld [vmem:[#allocation8 + $0x58] sm:$0xff]  ;;  %v414_v39 = vpack.c.bf16 %v97_v35, %v96_v34  ;;  %v98_v40 = vld [vmem:[#allocation5 + $0x70] sm:$0xff]  ;;  %v190_v43 = vld [vmem:[#allocation8 + $0x60] sm:$0xff] }
  0x65   :  { %424 = vmatpush3.bf16.msra.mxu1 %v423_v18  ;;  %v99_v41 = vld [vmem:[#allocation5 + $0x78] sm:$0xff]  ;;  %v435_v42 = vpack.c.bf16 %v189_v38, %v188_v37  ;;  %v191_v44 = vld [vmem:[#allocation8 + $0x68] sm:$0xff]  ;;  %v289_v51 = vld [vmem:[#allocation7] ss:$0 sm:$0xff] }
  0x66   :  { %425 = vmatprep.subr.bf16.mxu1 %v601_v0  ;;  %v417_v45 = vpack.c.bf16 %v99_v41, %v98_v40  ;;  %v438_v46 = vpack.c.bf16 %v191_v44, %v190_v43  ;;  %v83_v47 = vld [vmem:[#allocation2] sm:$0xff]  ;;  %v290_v56 = vld [vmem:[#allocation10] ss:$0 sm:$0xff] }
  0x67   :  { %403 = vmatpush3.bf16.msra.mxu0 %v402_v14  ;;  %v192_v48 = vld [vmem:[#allocation8 + $0x70] sm:$0xff]  ;;  %v193_v49 = vld [vmem:[#allocation8 + $0x78] sm:$0xff] }
  0x68   :  { %404 = vmatprep.subr.bf16.mxu0 %v601_v0  ;;  %v441_v50 = vpack.c.bf16 %v193_v49, %v192_v48 }
  0x69   :  { %427 = vmatpush3.bf16.msra.mxu1 %v426_v24 }
  0x6a   :  { %428 = vmatprep.subr.bf16.mxu1 %v601_v0 }
  0x6b   :  { %406 = vmatpush3.bf16.msra.mxu0 %v405_v21 }
  0x6c   :  { %407 = vmatprep.subr.bf16.mxu0 %v601_v0 }
  0x6d   :  { %430 = vmatpush3.bf16.msra.mxu1 %v429_v30 }
  0x6e   :  { %431 = vmatprep.subr.bf16.mxu1 %v601_v0 }
  0x6f   :  { %409 = vmatpush3.bf16.msra.mxu0 %v408_v27 }
  0x70   :  { %410 = vmatprep.subr.bf16.mxu0 %v601_v0 }
  0x71   :  { %433 = vmatpush3.bf16.msra.mxu1 %v432_v36 }
  0x72   :  { %434 = vmatprep.subr.bf16.mxu1 %v601_v0 }
  0x73   :  { %412 = vmatpush3.bf16.msra.mxu0 %v411_v33 }
  0x74   :  { %413 = vmatprep.subr.bf16.mxu0 %v601_v0 }
  0x75   :  { %436 = vmatpush3.bf16.msra.mxu1 %v435_v42 }
  0x76   :  { %437 = vmatprep.subr.bf16.mxu1 %v601_v0 }
  0x77   :  { %415 = vmatpush3.bf16.msra.mxu0 %v414_v39 }
  0x78   :  { %416 = vmatprep.subr.bf16.mxu0 %v601_v0 }
  0x79   :  { %439 = vmatpush3.bf16.msra.mxu1 %v438_v46 }
  0x7a   :  { %440 = vmatprep.subr.bf16.mxu1 %v601_v0 }
  0x7b   :  { %418 = vmatpush3.bf16.msra.mxu0 %v417_v45 }
  0x7d   :  { %442 = vmatpush3.bf16.msra.mxu1 %v441_v50 }
  0x7e   :  { %358 = vmatmul.mubr.f32.vlgmr.msra.gmra.mrb[0].mxu0 %v83_v47 }
 0x151   :  { %v173_v52 = vpop.f32.mrb[0].mxu0 }
 0x152   :  { %v174_v53 = vadd.f32 %v289_v51, %v173_v52  ;;  %v359_v54 = vpop.f32.mrb[1].mxu0 }
 0x154   :  { %v177_v55 = vmax.f32 %v174_v53, 0.0 }
 0x156   :  { %393 = vmatmul.mubr.f32.vlgmr.msra.gmra.mrb[0].mxu1 %v177_v55 }
 0x229   :  { %v267_v57 = vpop.f32.mrb[0].mxu1 }
 0x22a   :  { %v268_v58 = vadd.f32 %v290_v56, %v267_v57  ;;  %v394_v59 = vpop.f32.mrb[1].mxu1 }
 0x22c   :  { %271 = vst [vmem:[#allocation11] sm:$0xff] %v268_v58 }
 0x22d   :  { %575 = shalt.err (!%p572_p2)
}
 0x22e   :  { %s576_s30 = scalar_lea.hbm %s728_s5, 128 }
 0x22f   :  { %p577_p3 = scmp.ne.s32.totalorder %s728_s5, %s576_s30  ;;  %p580_p4 = scmp.lt.u32.totalorder %s576_s30, %s728_s5 }
 0x231   :  { %p582_p5 = pnand %p580_p4, %p577_p3 }
 0x233   :  { %585 = shalt.err (!%p582_p5)
}
 0x234   :  { %281 = dma.vmem_to_hbm [thread:$0]  %s279_s27, 128, %s728_s5, [#allocation4]  }
 0x235   :  { %592 = dma.done.wait [#allocation4], 128  }
 0x236   :  { %593 = vsyncadd [#allocation4], 4294967168 }
 0x237   :  { %285 = vsyncpa [#allocation3], 1 }
 0x238   :  { %286 = vsyncpa [#allocation6], 1 }
 0x239   :  { %287 = vsyncpa [#allocation9], 1 }
 0x23a   :  { %288 = vsyncpa [#allocation4], 1 }

// kernel: _actor_forward_impl.1
= control target key start
LH: loop header
LB: loop body
LE: loop exit
PB: predicated region body
PF: predicated region fallthrough
CT: control target
= control target key end

     0   :  { %10 = vsyncpa [#allocation3], 0  ;;  %s723_s0 = inlined_call_operand.hbm [shape: f32[8,128], index: 0, kind: input, shape index: {}]   ;;  %s724_s1 = inlined_call_operand.hbm [shape: f32[128,128], index: 1, kind: input, shape index: {}]   ;;  %s725_s2 = inlined_call_operand.hbm [shape: f32[1,128], index: 2, kind: input, shape index: {}]   ;;  %s726_s3 = inlined_call_operand.hbm [shape: f32[128,128], index: 3, kind: input, shape index: {}]   ;;  %s727_s4 = inlined_call_operand.hbm [shape: f32[1,128], index: 4, kind: input, shape index: {}]   ;;  %s728_s5 = inlined_call_operand.hbm [shape: f32[8,128], index: 5, kind: output, shape index: {}]  }
   0x1   :  { %11 = vsyncpa [#allocation6], 0 }
   0x2   :  { %12 = vsyncpa [#allocation9], 0 }
   0x3   :  { %13 = vsyncpa [#allocation4], 0  ;;  %s594_s18 = smov [#allocation5]   ;;  %s454_s22 = scalar_lea.hbm %s724_s1, 2048 }
   0x4   :  { %s29_s19 = sshll.u32 %s594_s18, 4  ;;  %p455_p0 = scmp.ne.s32.totalorder %s724_s1, %s454_s22  ;;  %s30_s19 = int_to_ptr.vmem [resolvable:$true] %s29_s19 }
   0x5   :  { %p458_p1 = scmp.lt.u32.totalorder %s454_s22, %s724_s1 }
   0x7   :  { %p460_p2 = pnand %p458_p1, %p455_p0 }
   0x9   :  { %463 = shalt.err (!%p460_p2)
}
   0xa   :  { %s464_s27 = scalar_lea.vmem %s30_s19, 2048  ;;  %p469_p4 = scmp.lt.s32.totalorder %s30_s19, %s30_s19 }
   0xb   :  { %p465_p3 = scmp.ne.s32.totalorder %s30_s19, %s464_s27  ;;  %p470_p5 = scmp.lt.s32.totalorder %s464_s27, %s464_s27 }
   0xd   :  { %p471_p6 = por %p470_p5, %p469_p4 }
   0xf   :  { %p472_p7 = pnand %p471_p6, %p465_p3 }
  0x11   :  { %475 = shalt.err (!%p472_p7)
}
  0x12   :  { %s595_s28 = smov 128   ;;  %s596_s29 = smov 8  }
  0x13   :  { %35 = dma.hbm_to_vmem [thread:$0]  %s724_s1, 2048, %s30_s19, [#allocation6], %s595_s28, %s595_s28, %s596_s29  }
  0x14   :  { %s597_s7 = smov [#allocation8]   ;;  %s598_s9 = smov [#allocation2]  }
  0x15   :  { %s51_s8 = sshll.u32 %s597_s7, 4  ;;  %s20_s10 = sshll.u32 %s598_s9, 4  ;;  %s52_s8 = int_to_ptr.vmem [resolvable:$true] %s51_s8  ;;  %s21_s10 = int_to_ptr.vmem [resolvable:$true] %s20_s10 }
  0x16   :  { %s476_s13 = scalar_lea.hbm %s726_s3, 2048 }
  0x17   :  { %p477_p8 = scmp.ne.s32.totalorder %s726_s3, %s476_s13  ;;  %p480_p9 = scmp.lt.u32.totalorder %s476_s13, %s726_s3 }
  0x19   :  { %p482_p10 = pnand %p480_p9, %p477_p8 }
  0x1b   :  { %485 = shalt.err (!%p482_p10)
}
  0x1c   :  { %s486_s1 = scalar_lea.vmem %s52_s8, 2048  ;;  %p491_p12 = scmp.lt.s32.totalorder %s52_s8, %s52_s8 }
  0x1d   :  { %p487_p11 = scmp.ne.s32.totalorder %s52_s8, %s486_s1  ;;  %p492_p13 = scmp.lt.s32.totalorder %s486_s1, %s486_s1 }
  0x1f   :  { %p493_p0 = por %p492_p13, %p491_p12 }
  0x21   :  { %p494_p1 = pnand %p493_p0, %p487_p11 }
  0x23   :  { %497 = shalt.err (!%p494_p1)
}
  0x24   :  { %57 = dma.hbm_to_vmem [thread:$0]  %s726_s3, 2048, %s52_s8, [#allocation9], %s595_s28, %s595_s28, %s596_s29  }
  0x25   :  { %s498_s22 = scalar_lea.hbm %s723_s0, 128 }
  0x26   :  { %p499_p2 = scmp.ne.s32.totalorder %s723_s0, %s498_s22  ;;  %p502_p3 = scmp.lt.u32.totalorder %s498_s22, %s723_s0 }
  0x28   :  { %p504_p4 = pnand %p502_p3, %p499_p2 }
  0x2a   :  { %507 = shalt.err (!%p504_p4)
}
  0x2b   :  { %s508_s27 = scalar_lea.vmem %s21_s10, 128  ;;  %p513_p6 = scmp.lt.s32.totalorder %s21_s10, %s21_s10 }
  0x2c   :  { %p509_p5 = scmp.ne.s32.totalorder %s21_s10, %s508_s27  ;;  %p514_p7 = scmp.lt.s32.totalorder %s508_s27, %s508_s27 }
  0x2e   :  { %p515_p8 = por %p514_p7, %p513_p6 }
  0x30   :  { %p516_p9 = pnand %p515_p8, %p509_p5 }
  0x32   :  { %519 = shalt.err (!%p516_p9)
}
  0x33   :  { %23 = dma.hbm_to_vmem [thread:$0]  %s723_s0, 128, %s21_s10, [#allocation3]  }
  0x34   :  { %s599_s29 = smov [#allocation7]   ;;  %s600_s6 = smov [#allocation10]  }
  0x35   :  { %s42_s30 = sshll.u32 %s599_s29, 4  ;;  %s64_s7 = sshll.u32 %s600_s6, 4  ;;  %s43_s30 = int_to_ptr.vmem [resolvable:$true] %s42_s30  ;;  %s65_s7 = int_to_ptr.vmem [resolvable:$true] %s64_s7 }
  0x36   :  { %s520_s11 = scalar_lea.hbm %s725_s2, 16 }
  0x37   :  { %p521_p10 = scmp.ne.s32.totalorder %s725_s2, %s520_s11  ;;  %p524_p11 = scmp.lt.u32.totalorder %s520_s11, %s725_s2 }
  0x39   :  { %p526_p12 = pnand %p524_p11, %p521_p10 }
  0x3b   :  { %529 = shalt.err (!%p526_p12)
}
  0x3c   :  { %s530_s0 = scalar_lea.vmem %s43_s30, 16  ;;  %s534_s10 = scalar_lea.vmem %s43_s30, 32 }
  0x3d   :  { %p531_p13 = scmp.ne.s32.totalorder %s43_s30, %s530_s0  ;;  %p535_p0 = scmp.lt.s32.totalorder %s43_s30, %s43_s30 }
  0x3e   :  { %p536_p1 = scmp.lt.s32.totalorder %s534_s10, %s530_s0 }
  0x40   :  { %p537_p2 = por %p536_p1, %p535_p0 }
  0x42   :  { %p538_p3 = pnand %p537_p2, %p531_p13 }
  0x44   :  { %541 = shalt.err (!%p538_p3)
}
  0x45   :  { %45 = dma.hbm_to_vmem [thread:$0]  %s725_s2, 16, %s43_s30, [#allocation6]  }
  0x46   :  { %s542_s19 = scalar_lea.hbm %s727_s4, 16 }
  0x47   :  { %p543_p4 = scmp.ne.s32.totalorder %s727_s4, %s542_s19  ;;  %p546_p5 = scmp.lt.u32.totalorder %s542_s19, %s727_s4 }
  0x49   :  { %p548_p6 = pnand %p546_p5, %p543_p4 }
  0x4b   :  { %551 = shalt.err (!%p548_p6)
}
  0x4c   :  { %s552_s24 = scalar_lea.vmem %s65_s7, 16  ;;  %s556_s25 = scalar_lea.vmem %s65_s7, 32 }
  0x4d   :  { %p553_p7 = scmp.ne.s32.totalorder %s65_s7, %s552_s24  ;;  %p557_p8 = scmp.lt.s32.totalorder %s65_s7, %s65_s7 }
  0x4e   :  { %p558_p9 = scmp.lt.s32.totalorder %s556_s25, %s552_s24 }
  0x50   :  { %p559_p10 = por %p558_p9, %p557_p8 }
  0x52   :  { %p560_p11 = pnand %p559_p10, %p553_p7 }
  0x54   :  { %563 = shalt.err (!%p560_p11)
}
  0x55   :  { %67 = dma.hbm_to_vmem [thread:$0]  %s727_s4, 16, %s65_s7, [#allocation9]  }
  0x56   :  { %586 = dma.done.wait [#allocation3], 128  }
  0x57   :  { %587 = vsyncadd [#allocation3], 4294967168 }
  0x58   :  { %588 = dma.done.wait [#allocation6], 2064  }
  0x59   :  { %589 = vsyncadd [#allocation6], 4294965232 }
  0x5a   :  { %590 = dma.done.wait [#allocation9], 2064  }
  0x5b   :  { %591 = vsyncadd [#allocation9], 4294965232  ;;  %v601_v0 = vmov 0.0|0.0   ;;  %vm602_vm0 = vmmov 0   ;;  %v603_v1 = vmov 0.0   ;;  %v84_v2 = vld [vmem:[#allocation5] sm:$0xff] }
  0x5c   :  { %395 = vmatprep.subr.bf16.mxu0 %v601_v0  ;;  %357 = vmatprep.mubr.msk.f32.mxu0 %vm602_vm0, %v603_v1  ;;  %v85_v3 = vld [vmem:[#allocation5 + $0x8] sm:$0xff]  ;;  %v86_v4 = vld [vmem:[#allocation5 + $0x10] sm:$0xff]  ;;  %v87_v6 = vld [vmem:[#allocation5 + $0x18] sm:$0xff]  ;;  %s604_s4 = smov [#allocation11]  }
  0x5d   :  { %419 = vmatprep.subr.bf16.mxu1 %v601_v0  ;;  %392 = vmatprep.mubr.msk.f32.mxu1 %vm602_vm0, %v603_v1  ;;  %v396_v5 = vpack.c.bf16 %v85_v3, %v84_v2  ;;  %v399_v7 = vpack.c.bf16 %v87_v6, %v86_v4  ;;  %v88_v8 = vld [vmem:[#allocation5 + $0x20] sm:$0xff]  ;;  %v89_v9 = vld [vmem:[#allocation5 + $0x28] sm:$0xff]  ;;  %v180_v12 = vld [vmem:[#allocation8 + $0x10] sm:$0xff]  ;;  %s278_s27 = sshll.u32 %s604_s4, 4  ;;  %s279_s27 = int_to_ptr.vmem [resolvable:$true] %s278_s27 }
  0x5e   :  { %v178_v10 = vld [vmem:[#allocation8] sm:$0xff]  ;;  %v179_v11 = vld [vmem:[#allocation8 + $0x8] sm:$0xff]  ;;  %v181_v13 = vld [vmem:[#allocation8 + $0x18] sm:$0xff]  ;;  %v402_v14 = vpack.c.bf16 %v89_v9, %v88_v8  ;;  %s564_s3 = scalar_lea.vmem %s279_s27, 128  ;;  %p569_p13 = scmp.lt.s32.totalorder %s279_s27, %s279_s27 }
  0x5f   :  { %397 = vmatpush3.bf16.msra.mxu0 %v396_v5  ;;  %v420_v15 = vpack.c.bf16 %v179_v11, %v178_v10  ;;  %v90_v16 = vld [vmem:[#allocation5 + $0x30] sm:$0xff]  ;;  %v91_v17 = vld [vmem:[#allocation5 + $0x38] sm:$0xff]  ;;  %v423_v18 = vpack.c.bf16 %v181_v13, %v180_v12  ;;  %v182_v19 = vld [vmem:[#allocation8 + $0x20] sm:$0xff]  ;;  %p565_p12 = scmp.ne.s32.totalorder %s279_s27, %s564_s3  ;;  %p570_p0 = scmp.lt.s32.totalorder %s564_s3, %s564_s3 }
  0x60   :  { %398 = vmatprep.subr.bf16.mxu0 %v601_v0  ;;  %v183_v20 = vld [vmem:[#allocation8 + $0x28] sm:$0xff]  ;;  %v405_v21 = vpack.c.bf16 %v91_v17, %v90_v16  ;;  %v92_v22 = vld [vmem:[#allocation5 + $0x40] sm:$0xff]  ;;  %v184_v25 = vld [vmem:[#allocation8 + $0x30] sm:$0xff] }
  0x61   :  { %421 = vmatpush3.bf16.msra.mxu1 %v420_v15  ;;  %v93_v23 = vld [vmem:[#allocation5 + $0x48] sm:$0xff]  ;;  %v426_v24 = vpack.c.bf16 %v183_v20, %v182_v19  ;;  %v185_v26 = vld [vmem:[#allocation8 + $0x38] sm:$0xff]  ;;  %v94_v28 = vld [vmem:[#allocation5 + $0x50] sm:$0xff]  ;;  %p571_p1 = por %p570_p0, %p569_p13 }
  0x62   :  { %422 = vmatprep.subr.bf16.mxu1 %v601_v0  ;;  %v408_v27 = vpack.c.bf16 %v93_v23, %v92_v22  ;;  %v95_v29 = vld [vmem:[#allocation5 + $0x58] sm:$0xff]  ;;  %v429_v30 = vpack.c.bf16 %v185_v26, %v184_v25  ;;  %v186_v31 = vld [vmem:[#allocation8 + $0x40] sm:$0xff]  ;;  %v187_v32 = vld [vmem:[#allocation8 + $0x48] sm:$0xff] }
  0x63   :  { %400 = vmatpush3.bf16.msra.mxu0 %v399_v7  ;;  %v411_v33 = vpack.c.bf16 %v95_v29, %v94_v28  ;;  %v96_v34 = vld [vmem:[#allocation5 + $0x60] sm:$0xff]  ;;  %v97_v35 = vld [vmem:[#allocation5 + $0x68] sm:$0xff]  ;;  %v432_v36 = vpack.c.bf16 %v187_v32, %v186_v31  ;;  %v188_v37 = vld [vmem:[#allocation8 + $0x50] sm:$0xff]  ;;  %p572_p2 = pnand %p571_p1, %p565_p12 }
  0x64   :  { %401 = vmatprep.subr.bf16.mxu0 %v601_v0  ;;  %v189_v38 = vld [vmem:[#allocation8 + $0x58] sm:$0xff]  ;;  %v414_v39 = vpack.c.bf16 %v97_v35, %v96_v34  ;;  %v98_v40 = vld [vmem:[#allocation5 + $0x70] sm:$0xff]  ;;  %v190_v43 = vld [vmem:[#allocation8 + $0x60] sm:$0xff] }
  0x65   :  { %424 = vmatpush3.bf16.msra.mxu1 %v423_v18  ;;  %v99_v41 = vld [vmem:[#allocation5 + $0x78] sm:$0xff]  ;;  %v435_v42 = vpack.c.bf16 %v189_v38, %v188_v37  ;;  %v191_v44 = vld [vmem:[#allocation8 + $0x68] sm:$0xff]  ;;  %v289_v51 = vld [vmem:[#allocation7] ss:$0 sm:$0xff] }
  0x66   :  { %425 = vmatprep.subr.bf16.mxu1 %v601_v0  ;;  %v417_v45 = vpack.c.bf16 %v99_v41, %v98_v40  ;;  %v438_v46 = vpack.c.bf16 %v191_v44, %v190_v43  ;;  %v83_v47 = vld [vmem:[#allocation2] sm:$0xff]  ;;  %v290_v56 = vld [vmem:[#allocation10] ss:$0 sm:$0xff] }
  0x67   :  { %403 = vmatpush3.bf16.msra.mxu0 %v402_v14  ;;  %v192_v48 = vld [vmem:[#allocation8 + $0x70] sm:$0xff]  ;;  %v193_v49 = vld [vmem:[#allocation8 + $0x78] sm:$0xff] }
  0x68   :  { %404 = vmatprep.subr.bf16.mxu0 %v601_v0  ;;  %v441_v50 = vpack.c.bf16 %v193_v49, %v192_v48 }
  0x69   :  { %427 = vmatpush3.bf16.msra.mxu1 %v426_v24 }
  0x6a   :  { %428 = vmatprep.subr.bf16.mxu1 %v601_v0 }
  0x6b   :  { %406 = vmatpush3.bf16.msra.mxu0 %v405_v21 }
  0x6c   :  { %407 = vmatprep.subr.bf16.mxu0 %v601_v0 }
  0x6d   :  { %430 = vmatpush3.bf16.msra.mxu1 %v429_v30 }
  0x6e   :  { %431 = vmatprep.subr.bf16.mxu1 %v601_v0 }
  0x6f   :  { %409 = vmatpush3.bf16.msra.mxu0 %v408_v27 }
  0x70   :  { %410 = vmatprep.subr.bf16.mxu0 %v601_v0 }
  0x71   :  { %433 = vmatpush3.bf16.msra.mxu1 %v432_v36 }
  0x72   :  { %434 = vmatprep.subr.bf16.mxu1 %v601_v0 }
  0x73   :  { %412 = vmatpush3.bf16.msra.mxu0 %v411_v33 }
  0x74   :  { %413 = vmatprep.subr.bf16.mxu0 %v601_v0 }
  0x75   :  { %436 = vmatpush3.bf16.msra.mxu1 %v435_v42 }
  0x76   :  { %437 = vmatprep.subr.bf16.mxu1 %v601_v0 }
  0x77   :  { %415 = vmatpush3.bf16.msra.mxu0 %v414_v39 }
  0x78   :  { %416 = vmatprep.subr.bf16.mxu0 %v601_v0 }
  0x79   :  { %439 = vmatpush3.bf16.msra.mxu1 %v438_v46 }
  0x7a   :  { %440 = vmatprep.subr.bf16.mxu1 %v601_v0 }
  0x7b   :  { %418 = vmatpush3.bf16.msra.mxu0 %v417_v45 }
  0x7d   :  { %442 = vmatpush3.bf16.msra.mxu1 %v441_v50 }
  0x7e   :  { %358 = vmatmul.mubr.f32.vlgmr.msra.gmra.mrb[0].mxu0 %v83_v47 }
 0x151   :  { %v173_v52 = vpop.f32.mrb[0].mxu0 }
 0x152   :  { %v174_v53 = vadd.f32 %v289_v51, %v173_v52  ;;  %v359_v54 = vpop.f32.mrb[1].mxu0 }
 0x154   :  { %v177_v55 = vmax.f32 %v174_v53, 0.0 }
 0x156   :  { %393 = vmatmul.mubr.f32.vlgmr.msra.gmra.mrb[0].mxu1 %v177_v55 }
 0x229   :  { %v267_v57 = vpop.f32.mrb[0].mxu1 }
 0x22a   :  { %v268_v58 = vadd.f32 %v290_v56, %v267_v57  ;;  %v394_v59 = vpop.f32.mrb[1].mxu1 }
 0x22c   :  { %271 = vst [vmem:[#allocation11] sm:$0xff] %v268_v58 }
 0x22d   :  { %575 = shalt.err (!%p572_p2)
}
 0x22e   :  { %s576_s30 = scalar_lea.hbm %s728_s5, 128 }
 0x22f   :  { %p577_p3 = scmp.ne.s32.totalorder %s728_s5, %s576_s30  ;;  %p580_p4 = scmp.lt.u32.totalorder %s576_s30, %s728_s5 }
 0x231   :  { %p582_p5 = pnand %p580_p4, %p577_p3 }
 0x233   :  { %585 = shalt.err (!%p582_p5)
}
 0x234   :  { %281 = dma.vmem_to_hbm [thread:$0]  %s279_s27, 128, %s728_s5, [#allocation4]  }
 0x235   :  { %592 = dma.done.wait [#allocation4], 128  }
 0x236   :  { %593 = vsyncadd [#allocation4], 4294967168 }
 0x237   :  { %285 = vsyncpa [#allocation3], 1 }
 0x238   :  { %286 = vsyncpa [#allocation6], 1 }
 0x239   :  { %287 = vsyncpa [#allocation9], 1 }
 0x23a   :  { %288 = vsyncpa [#allocation4], 1 }

</bundles_post_ra>
